<compile_context>
chip_gen: v6e
topology: v6e:2x2x1
jax: 0.10.0
libtpu: 0.0.40
codegen_flags: <defaults>
</compile_context>

<pallas_src>
import math
import functools

import jax
import jax.numpy as jnp
from jax.experimental import pallas as pl
from jax.experimental.pallas import tpu as pltpu


def _semantic_decoder_kernel(x_ref, w1_ref, b1_ref, w2_ref, b2_ref, out_ref,
                             *, bblk, seq, dim):
    # x_ref: (Bblk, S, D) bf16 ; w1: (D, D) bf16 ; b1: (1, D) f32
    # w2: (D, C) bf16 ; b2: (1, C) f32 ; out: (Bblk, C) f32
    x = x_ref[...]                                   # (Bblk, S, D) bf16
    x2d = x.reshape(bblk * seq, dim)                 # merge leading dims (lane dim untouched)

    # Linear(D -> D): one big MXU matmul over all Bblk*S rows, f32 accumulate.
    h = jnp.dot(x2d, w1_ref[...], preferred_element_type=jnp.float32)   # (Bblk*S, D) f32
    h = h + b1_ref[...]                                                  # broadcast (1, D)
    h = h.reshape(bblk, seq, dim)                                        # (Bblk, S, D)

    # max over the sequence dimension (torch: input_feat.max(1)).
    pooled = jnp.max(h, axis=1)                                          # (Bblk, D) f32

    # event_classifier: Linear(D -> C), bf16 MXU matmul + f32 bias.
    logits = jnp.dot(pooled.astype(jnp.bfloat16), w2_ref[...],
                     preferred_element_type=jnp.float32) + b2_ref[...]   # (Bblk, C) f32

    out_ref[...] = logits.astype(out_ref.dtype)


def semantic_decoder(x, w1, b1, w2, b2, *, block_b=None):
    """Fused Semantic_Decoder forward.

    x  : (B, S, D) float32
    w1 : (D, D)  b1 : (1, D)   -- self.linear           (weights pre-transposed to (in, out))
    w2 : (D, C)  b2 : (1, C)   -- self.event_classifier
    returns (B, C) float32
    """
    B, S, D = x.shape
    C = w2.shape[1]

    if block_b is None:
        block_b = min(B, 8)
    assert B % block_b == 0, "batch must be divisible by the batch block"
    grid = (B // block_b,)

    # bf16 matmul inputs (halves DMA bytes; MXU runs bf16 with f32 accumulation).
    x_bf = x.astype(jnp.bfloat16)
    w1_bf = w1.astype(jnp.bfloat16)
    w2_bf = w2.astype(jnp.bfloat16)

    kernel = functools.partial(_semantic_decoder_kernel,
                               bblk=block_b, seq=S, dim=D)

    return pl.pallas_call(
        kernel,
        out_shape=jax.ShapeDtypeStruct((B, C), jnp.float32),
        grid=grid,
        in_specs=[
            pl.BlockSpec((block_b, S, D), lambda i: (i, 0, 0)),   # activations: tile over batch
            pl.BlockSpec((D, D), lambda i: (0, 0)),               # linear weight (resident)
            pl.BlockSpec((1, D), lambda i: (0, 0)),               # linear bias
            pl.BlockSpec((D, C), lambda i: (0, 0)),               # classifier weight
            pl.BlockSpec((1, C), lambda i: (0, 0)),               # classifier bias
        ],
        out_specs=pl.BlockSpec((block_b, C), lambda i: (i, 0)),
        compiler_params=pltpu.CompilerParams(
            dimension_semantics=("parallel",)),
    )(x_bf, w1_bf, b1, w2_bf, b2)


def _reference(x, w1, b1, w2, b2):
    """Pure-JAX reference mirroring the PyTorch forward with the same bf16-matmul /
    f32-accumulate numerics as the kernel."""
    B, S, D = x.shape
    xb = x.astype(jnp.bfloat16).reshape(B * S, D)
    h = jnp.dot(xb, w1.astype(jnp.bfloat16),
                preferred_element_type=jnp.float32).reshape(B, S, D) + b1
    pooled = jnp.max(h, axis=1)
    logits = jnp.dot(pooled.astype(jnp.bfloat16), w2.astype(jnp.bfloat16),
                     preferred_element_type=jnp.float32) + b2
    return logits


if __name__ == "__main__":
    # Small deterministic config consistent with the module's forward.
    B, S = 16, 8            # batch chosen so grid = (2,) with an 8-row batch block
    input_dim = 32
    class_num = 16

    key = jax.random.PRNGKey(0)
    k1, k2, k3, k4, k5 = jax.random.split(key, 5)

    # nn.Linear default init; weights stored pre-transposed as (in, out).
    lim = 1.0 / math.sqrt(input_dim)
    w1 = jax.random.uniform(k1, (input_dim, input_dim), jnp.float32, -lim, lim)
    b1 = jax.random.uniform(k2, (1, input_dim), jnp.float32, -lim, lim)
    w2 = jax.random.uniform(k3, (input_dim, class_num), jnp.float32, -lim, lim)
    b2 = jax.random.uniform(k4, (1, class_num), jnp.float32, -lim, lim)

    x = jax.random.normal(k5, (B, S, input_dim), jnp.float32)

    out = semantic_decoder(x, w1, b1, w2, b2)
    out = jax.block_until_ready(out)

    ref = _reference(x, w1, b1, w2, b2)
    assert out.shape == (B, class_num)
    assert jnp.allclose(out, ref, atol=2e-2, rtol=2e-2), "mismatch vs reference"
    print("KERNEL_OK")
</pallas_src>

<mosaic_0001>
module attributes {stable_mosaic.version = 11 : i64} {
  func.func @_semantic_decoder_kernel(%arg0: i32, %arg1: memref<8x8x32xbf16, #tpu.memory_space<vmem>>, %arg2: memref<32x32xbf16, #tpu.memory_space<vmem>>, %arg3: memref<1x32xf32, #tpu.memory_space<vmem>>, %arg4: memref<32x16xbf16, #tpu.memory_space<vmem>>, %arg5: memref<1x16xf32, #tpu.memory_space<vmem>>, %arg6: memref<8x16xf32, #tpu.memory_space<vmem>>) attributes {dimension_semantics = [#tpu.dimension_semantics<parallel>], iteration_bounds = array<i64: 2>, scalar_prefetch = 0 : i64, scratch_operands = 0 : i64, tpu.core_type = #tpu.core_type<tc>, window_params = [{transform_indices = @transform_0, window_bounds = array<i64: 8, 8, 32>}, {pipeline_mode = #tpu.pipeline_mode<synchronous>, transform_indices = @transform_1, window_bounds = array<i64: 32, 32>}, {pipeline_mode = #tpu.pipeline_mode<synchronous>, transform_indices = @transform_2, window_bounds = array<i64: 1, 32>}, {pipeline_mode = #tpu.pipeline_mode<synchronous>, transform_indices = @transform_3, window_bounds = array<i64: 32, 16>}, {pipeline_mode = #tpu.pipeline_mode<synchronous>, transform_indices = @transform_4, window_bounds = array<i64: 1, 16>}, {transform_indices = @transform_5, window_bounds = array<i64: 8, 16>}]} {
    %c0 = arith.constant 0 : index
    %c0_0 = arith.constant 0 : index
    %c0_1 = arith.constant 0 : index
    %0 = vector.load %arg1[%c0, %c0_0, %c0_1] : memref<8x8x32xbf16, #tpu.memory_space<vmem>>, vector<8x8x32xbf16>
    %1 = vector.shape_cast %0 : vector<8x8x32xbf16> to vector<64x32xbf16>
    %c0_2 = arith.constant 0 : index
    %c0_3 = arith.constant 0 : index
    %2 = vector.load %arg2[%c0_2, %c0_3] : memref<32x32xbf16, #tpu.memory_space<vmem>>, vector<32x32xbf16>
    %cst = arith.constant dense<0.000000e+00> : vector<64x32xf32>
    %3 = tpu.matmul %1, %2, %cst {dimension_numbers = #tpu.dot_dimension_numbers<[1], [0], [0], [1], [0, 0, 1, 1], [], []>} : vector<64x32xbf16>, vector<32x32xbf16>, vector<64x32xf32> -> vector<64x32xf32>
    %c0_4 = arith.constant 0 : index
    %c0_5 = arith.constant 0 : index
    %4 = vector.load %arg3[%c0_4, %c0_5] : memref<1x32xf32, #tpu.memory_space<vmem>>, vector<1x32xf32>
    %5 = vector.broadcast %4 : vector<1x32xf32> to vector<64x32xf32>
    %6 = arith.addf %3, %5 : vector<64x32xf32>
    %7 = vector.shape_cast %6 : vector<64x32xf32> to vector<8x8x32xf32>
    %cst_6 = arith.constant dense<0xFF800000> : vector<8x32xf32>
    %8 = vector.multi_reduction <maximumf>, %7, %cst_6 [1] : vector<8x8x32xf32> to vector<8x32xf32>
    %9 = arith.truncf %8 : vector<8x32xf32> to vector<8x32xbf16>
    %c0_7 = arith.constant 0 : index
    %c0_8 = arith.constant 0 : index
    %10 = vector.load %arg4[%c0_7, %c0_8] : memref<32x16xbf16, #tpu.memory_space<vmem>>, vector<32x16xbf16>
    %cst_9 = arith.constant dense<0.000000e+00> : vector<8x16xf32>
    %11 = tpu.matmul %9, %10, %cst_9 {dimension_numbers = #tpu.dot_dimension_numbers<[1], [0], [0], [1], [0, 0, 1, 1], [], []>} : vector<8x32xbf16>, vector<32x16xbf16>, vector<8x16xf32> -> vector<8x16xf32>
    %c0_10 = arith.constant 0 : index
    %c0_11 = arith.constant 0 : index
    %12 = vector.load %arg5[%c0_10, %c0_11] : memref<1x16xf32, #tpu.memory_space<vmem>>, vector<1x16xf32>
    %13 = vector.broadcast %12 : vector<1x16xf32> to vector<8x16xf32>
    %14 = arith.addf %11, %13 : vector<8x16xf32>
    %c0_12 = arith.constant 0 : index
    %c0_13 = arith.constant 0 : index
    %15 = vector.load %arg6[%c0_12, %c0_13] : memref<8x16xf32, #tpu.memory_space<vmem>>, vector<8x16xf32>
    tpu.vector_store %arg6[%c0_12, %c0_13], %14 {strides = array<i32>} : memref<8x16xf32, #tpu.memory_space<vmem>>, vector<8x16xf32>,
    return
  }
  func.func @transform_0(%arg0: i32) -> (i32, i32, i32) {
    %c0_i32 = arith.constant 0 : i32
    %c0_i32_0 = arith.constant 0 : i32
    %c0_i32_1 = arith.constant 0 : i32
    return %arg0, %c0_i32, %c0_i32_0 : i32, i32, i32
  }
  func.func @transform_1(%arg0: i32) -> (i32, i32) {
    %c0_i32 = arith.constant 0 : i32
    %c0_i32_0 = arith.constant 0 : i32
    %c0_i32_1 = arith.constant 0 : i32
    return %c0_i32, %c0_i32_0 : i32, i32
  }
  func.func @transform_2(%arg0: i32) -> (i32, i32) {
    %c0_i32 = arith.constant 0 : i32
    %c0_i32_0 = arith.constant 0 : i32
    %c0_i32_1 = arith.constant 0 : i32
    return %c0_i32, %c0_i32_0 : i32, i32
  }
  func.func @transform_3(%arg0: i32) -> (i32, i32) {
    %c0_i32 = arith.constant 0 : i32
    %c0_i32_0 = arith.constant 0 : i32
    %c0_i32_1 = arith.constant 0 : i32
    return %c0_i32, %c0_i32_0 : i32, i32
  }
  func.func @transform_4(%arg0: i32) -> (i32, i32) {
    %c0_i32 = arith.constant 0 : i32
    %c0_i32_0 = arith.constant 0 : i32
    %c0_i32_1 = arith.constant 0 : i32
    return %c0_i32, %c0_i32_0 : i32, i32
  }
  func.func @transform_5(%arg0: i32) -> (i32, i32) {
    %c0_i32 = arith.constant 0 : i32
    %c0_i32_0 = arith.constant 0 : i32
    return %arg0, %c0_i32 : i32, i32
  }
}

</mosaic_0001>

<bundles_post_ra>
// kernel: tpu_custom_call.1
= control target key start
LH: loop header
LB: loop body
LE: loop exit
PB: predicated region body
PF: predicated region fallthrough
CT: control target
= control target key end

     0   :  { %10 = vsyncpa [#allocation3], 0  ;;  %s1051_s0 = inlined_call_operand.hbm [shape: bf16[16,8,32], index: 0, kind: input, shape index: {}]   ;;  %s1052_s1 = inlined_call_operand.vmem [shape: bf16[32,32], index: 1, kind: input, shape index: {}]   ;;  %s1053_s2 = inlined_call_operand.vmem [shape: f32[1,32], index: 2, kind: input, shape index: {}]   ;;  %s1054_s3 = inlined_call_operand.vmem [shape: bf16[32,16], index: 3, kind: input, shape index: {}]   ;;  %s1055_s4 = inlined_call_operand.vmem [shape: f32[1,16], index: 4, kind: input, shape index: {}]   ;;  %s1056_s5 = inlined_call_operand.hbm [shape: f32[16,16], index: 5, kind: output, shape index: {}]  }
   0x1   :  { %12 = vsyncpa [#allocation3 + $0x1], 0 }
   0x2   :  { %13 = vsyncpa [#allocation4], 0 }
   0x3   :  { %15 = vsyncpa [#allocation4 + $0x1], 0  ;;  %s867_s18 = smov 0   ;;  %s869_s19 = smov 0  }
   0x4   :  { %s871_s20 = smov 0   ;;  %s873_s21 = smov 0  }
   0x5 LB: > { %s888_s22 = sadd.s32 4294967295, %s829_s21   ;;  %s621_s23 = sadd.s32 4294967294, %s829_s21   ;;  %s829_s21 = sphi %s873_s21, %s1071_s21   ;;  %s825_s20 = sphi %s871_s20, %s1070_s20   ;;  %s821_s19 = sphi %s869_s19, %s1069_s19   ;;  %s817_s18 = sphi %s867_s18, %s1068_s18  }
   0x6   : > { %s892_s24 = sadd.s32 1, %s829_s21   ;;  %s28_s25 = sadd.s32 1, %s825_s20 }
   0x7   : > { %s25_s26 = ssub.s32 %s829_s21, %s892_s24  ;;  %p35_p0 = scmp.ne.s32.totalorder %s825_s20, %s821_s19 }
   0x8   : > { %p26_p1 = scmp.eq.s32.totalorder %s25_s26, 0  ;;  %p36_p2 = scmp.eq.s32.totalorder %s829_s21, 0 }
   0x9   : > { %p41_p3 = scmp.ne.s32.totalorder %s821_s19, %s817_s18  ;;  %p42_p4 = scmp.eq.s32.totalorder %s888_s22, 0 }
   0xa   : > { %s904_s27 = scalar_select %p26_p1, %s825_s20, %s28_s25  }
   0xb   : > { %p906_p5 = por %p36_p2, %p35_p0  ;;  %p910_p6 = por %p42_p4, %p41_p3 }
   0xc   : > { %p149_p7 = scmp.eq.s32.totalorder %s888_s22, 1  ;;  %p155_p8 = scmp.eq.s32.totalorder %s621_s23, 1 }
   0xd   : > { %s1060_s29 = scalar_select %p910_p6, 1, 0 }
   0xe   : > { %p691_p10 = scmp.lt.s32.totalorder %s829_s21, 2  ;;  %p917_p11 = por %p149_p7, %p35_p0 }
   0xf   : > { %p921_p12 = por %p155_p8, %p41_p3  ;;  %s187_s7 = sand.u32 1, %s825_s20  }
  0x10   : > { %s1061_s30 = scalar_select %p917_p11, 1, 0 }
  0x11   : > { %s1062_s6 = scalar_select %p921_p12, 1, 0 }
  0x12   : > { %s649_s8 = sshll.u32 %s829_s21, 9  ;;  %s624_s9 = sshll.u32 %s187_s7, 5 }
  0x13   : > { %s930_s12 = scalar_lea.hbm %s1051_s0, %s649_s8  ;;  %s191_s13 = scalar_lea.vmem [#allocation2], %s624_s9 }
  0x14   : > { %s198_s14 = sshll.u32 %s191_s13, 4  ;;  %p934_p13 = pnand %p691_p10, %p906_p5  ;;  %s938_s14 = int_to_ptr.vmem [resolvable:$true] %s198_s14 }
  0x15   : > { %s940_s16 = scalar_lea.sflag [#allocation3], %s187_s7  ;;  %s737_s17 = scalar_lea.hbm %s930_s12, 512 }
  0x16   : > { %p738_p0 = scmp.ne.s32.totalorder %s930_s12, %s737_s17  ;;  %p739_p1 = pneg %p934_p13 }
  0x17   : > { %s742_s26 = scalar_lea.hbm %s1051_s0, 1024  ;;  %p743_p4 = scmp.lt.s32.totalorder %s930_s12, %s1051_s0 }
  0x18   : > { %p740_p2 = pnand %p739_p1, %p738_p0  ;;  %p744_p5 = scmp.lt.s32.totalorder %s742_s26, %s737_s17 }
  0x1a   : > { %p741_p3 = pneg %p740_p2  ;;  %p745_p7 = por %p744_p5, %p743_p4 }
  0x1c   : > { %p746_p8 = pnand %p745_p7, %p741_p3 }
  0x1e   : > { %749 = shalt.err (!%p746_p8)
}
  0x1f   : > { %s750_s7 = scalar_lea.vmem %s938_s14, 512  ;;  %s831_s9 = smov [#allocation2]  }
  0x20   : > { %p751_p10 = scmp.ne.s32.totalorder %s938_s14, %s750_s7  ;;  %s755_s10 = sshll.u32 %s831_s9, 4  ;;  %s756_s10 = int_to_ptr.vmem [resolvable:$false] %s755_s10 }
  0x21   : > { %s757_s11 = scalar_lea.vmem %s756_s10, 1024  ;;  %p758_p2 = scmp.lt.s32.totalorder %s938_s14, %s756_s10 }
  0x22   : > { %p753_p9 = pnand %p751_p10, %p739_p1  ;;  %p759_p12 = scmp.lt.s32.totalorder %s757_s11, %s750_s7 }
  0x24   : > { %p754_p0 = pneg %p753_p9  ;;  %p760_p11 = por %p759_p12, %p758_p2 }
  0x26   : > { %p761_p6 = pnand %p760_p11, %p754_p0 }
  0x28   : > { %764 = shalt.err (!%p761_p6)
}
  0x29   : > { %s832_s13 = smov 64   ;;  %s833_s17 = smov 4  }
  0x2a   : > { %686 = dma.hbm_to_vmem [thread:$0]  (!%p934_p13), %s930_s12, 512, %s938_s14, %s940_s16, %s832_s13, %s832_s13, %s833_s17  }
  0x2b   : > { %p627_p9 = scmp.ge.s32.totalorder %s829_s21, 1  ;;  %p206_p1 = scmp.lt.s32.totalorder %s829_s21, 3 }
  0x2d   : > { %p207_p3 = pnand %p627_p9, %p206_p1 }
  0x2e   : > { %s964_s23 = sand.u32 (!%p207_p3), 1, %s821_s19   ;;  %p1064_p6 = scmp.ne.s32.totalorder (!%p207_p3), %s1060_s29, 0 }
  0x2f   : > { %210 = sbr.rel (%p207_p3) target bundleno = 502 (0x1f6), region = 40  ;;  %s628_s25 = sshll.u32 (!%p207_p3), %s964_s23, 5 }
  0x30   : > { %s213_s26 = scalar_lea.sflag (!%p207_p3), [#allocation3], %s964_s23  ;;  %s216_s28 = scalar_lea.vmem (!%p207_p3), [#allocation2], %s628_s25 }
  0x34   : > { %808 = dma.done.wait (%p1064_p6), %s213_s26, 512  }
  0x35   : > { %810 = vsyncadd (%p1064_p6), %s213_s26, 4294966784  ;;  %v729_v0 = vld [vmem:[%s1052_s1 + $0x8] sm:$0xff]   ;;  %v730_v1 = vld [vmem:[%s1052_s1] sm:$0xff]   ;;  %vm296_vm0 = vcmask 261120   ;;  %v834_v7 = vmov 0.0   ;;  %vm835_vm1 = vmmov 0  }
  0x36   : > { %659 = vmatprep.subr.bf16.mxu0 %v729_v0  ;;  %v731_v2 = vld [vmem:[%s216_s28] sm:$0xff]   ;;  %v732_v3 = vld [vmem:[%s216_s28 + $0x8] sm:$0xff]   ;;  %v733_v4 = vld [vmem:[%s216_s28 + $0x10] sm:$0xff]   ;;  %671 = vmatprep.subr.bf16.mxu1 %v834_v7  ;;  %vm465_vm2 = vcmask 1041409   ;;  %vm467_vm3 = vcmask 1042434   ;;  %vm469_vm4 = vcmask 1043459  }
  0x37   : > { %660 = vmatpush3.bf16.msra.mxu0 %v729_v0  ;;  %663 = vmatprep.mubr.msk.bf16.mxu0 %vm296_vm0, %v731_v2  ;;  %v734_v5 = vld [vmem:[%s216_s28 + $0x18] sm:$0xff]   ;;  %v735_v6 = vld [vmem:[%s1054_s3 + $0x8] sm:$0xff]   ;;  %v736_v8 = vld [vmem:[%s1054_s3] sm:$0xff]   ;;  %vm471_vm5 = vcmask 1044484   ;;  %vm473_vm6 = vcmask 1045509   ;;  %vm475_vm7 = vcmask 1046534  }
  0x38   : > { %661 = vmatprep.subr.bf16.mxu0 %v730_v1  ;;  %672 = vmatpush3.bf16.msra.mxu1 %v735_v6  ;;  %v630_v9 = vld [vmem:[%s1053_s2] ss:$0 sm:$0xff]  ;;  %vm477_vm8 = vcmask 1047559   ;;  %s629_s13 = sshll.u32 %s964_s23, 3  ;;  %s646_s26 = sshll.u32 %s888_s22, 7  ;;  %vm535_vm9 = vcmask 130048  }
  0x39   : > { %673 = vmatprep.subr.bf16.mxu1 %v834_v7  ;;  %675 = vmatprep.mubr.msk.bf16.mxu1 %vm835_vm1, %v834_v7  ;;  %s242_s28 = scalar_lea.vmem [#allocation5], %s629_s13  ;;  %s1008_s16 = scalar_lea.hbm %s1056_s5, %s646_s26 }
  0x3a   : > { %s551_s15 = sshll.u32 %s242_s28, 4  ;;  %s538_s29 = scalar_lea.sflag [#allocation4], %s964_s23  ;;  %s1010_s15 = int_to_ptr.vmem [resolvable:$true] %s551_s15 }
  0x3b   : > { %662 = vmatpush3.bf16.msra.mxu0 %v730_v1  ;;  %s765_s22 = scalar_lea.vmem %s1010_s15, 128  ;;  %p1065_p12 = scmp.ne.s32.totalorder %s1061_s30, 0 }
  0x3c   : > { %674 = vmatpush3.bf16.msra.mxu1 %v736_v8  ;;  %p766_p11 = scmp.ne.s32.totalorder %s1010_s15, %s765_s22  ;;  %s836_s8 = smov [#allocation5]  }
  0x3d   : > { %s769_s7 = sshll.u32 %s836_s8, 4  ;;  %s770_s7 = int_to_ptr.vmem [resolvable:$false] %s769_s7 }
  0x3e   : > { %664 = vmatmul.mubr.msk.bf16.vlgmr.msra.gmra.mxu0 %vm296_vm0, %v732_v3  ;;  %p767_p13 = pnand %p766_p11, %p1065_p12  ;;  %s771_s9 = scalar_lea.vmem %s770_s7, 256 }
  0x3f   : > { %667 = vmatprep.mubr.msk.bf16.mxu0 %vm296_vm0, %v733_v4  ;;  %p772_p5 = scmp.lt.s32.totalorder %s1010_s15, %s770_s7  ;;  %p773_p7 = scmp.lt.s32.totalorder %s771_s9, %s765_s22 }
  0x40   : > { %p768_p4 = pneg %p767_p13 }
  0x41   : > { %p774_p8 = por %p773_p7, %p772_p5 }
  0x43   : > { %p775_p10 = pnand %p774_p8, %p768_p4 }
  0x46   : > { %668 = vmatmul.mubr.msk.bf16.gmra.mxu0 %vm296_vm0, %v734_v5 }
  0xfe   : > { %v665_v10 = vpop.f32.mrf.mxu0 }
  0xff   : > { %v352_v11 = vadd.f32 %v665_v10, %v630_v9 }
 0x100   : > { %v343_v12 = vpop.f32.mrf.mxu0 }
 0x101   : > { %v388_v13 = vsel %vm296_vm0, %v352_v11, -inf  ;;  %v344_v14 = vadd.f32 %v630_v9, %v343_v12 }
 0x102   : > { %v389_v15 = vrot.slane %v388_v13, 4  ;;  %v666_v16 = vpop.f32.mrf.mxu0 }
 0x103   : > { %v374_v17 = vsel %vm296_vm0, %v344_v14, -inf  ;;  %v355_v18 = vadd.f32 %v666_v16, %v630_v9 }
 0x104   : > { %v390_v19 = vmax.f32 %v388_v13, %v389_v15  ;;  %v375_v20 = vrot.slane %v374_v17, 4  ;;  %v346_v21 = vpop.f32.mrf.mxu0 }
 0x105   : > { %v395_v22 = vsel %vm296_vm0, %v355_v18, -inf  ;;  %v347_v23 = vadd.f32 %v630_v9, %v346_v21 }
 0x106   : > { %v391_v24 = vrot.slane %v390_v19, 2  ;;  %v376_v25 = vmax.f32 %v374_v17, %v375_v20  ;;  %v396_v26 = vrot.slane %v395_v22, 4  ;;  %v669_v27 = vpop.f32.mrf.mxu0 }
 0x107   : > { %v381_v28 = vsel %vm296_vm0, %v347_v23, -inf  ;;  %v368_v29 = vadd.f32 %v669_v27, %v630_v9 }
 0x108   : > { %v392_v30 = vmax.f32 %v390_v19, %v391_v24  ;;  %v377_v31 = vrot.slane %v376_v25, 2  ;;  %v397_v32 = vmax.f32 %v395_v22, %v396_v26  ;;  %v382_v33 = vrot.slane %v381_v28, 4  ;;  %v359_v34 = vpop.f32.mrf.mxu0 }
 0x109   : > { %v416_v35 = vsel %vm296_vm0, %v368_v29, -inf  ;;  %v360_v36 = vadd.f32 %v630_v9, %v359_v34 }
 0x10a   : > { %v378_v37 = vmax.f32 %v376_v25, %v377_v31  ;;  %v398_v38 = vrot.slane %v397_v32, 2  ;;  %v383_v39 = vmax.f32 %v381_v28, %v382_v33  ;;  %v670_v40 = vpop.f32.mrf.mxu0  ;;  %v417_v41 = vrot.slane %v416_v35, 4 }
 0x10b   : > { %v402_v42 = vsel %vm296_vm0, %v360_v36, -inf  ;;  %v371_v43 = vadd.f32 %v670_v40, %v630_v9  ;;  %v393_v44 = vrot.slane %v392_v30, 1 }
 0x10c   : > { %v379_v45 = vrot.slane %v378_v37, 1  ;;  %v399_v46 = vmax.f32 %v397_v32, %v398_v38  ;;  %v384_v47 = vrot.slane %v383_v39, 2  ;;  %v362_v48 = vpop.f32.mrf.mxu0  ;;  %v418_v49 = vmax.f32 %v416_v35, %v417_v41 }
 0x10d   : > { %v403_v50 = vrot.slane %v402_v42, 4  ;;  %v423_v51 = vsel %vm296_vm0, %v371_v43, -inf  ;;  %v363_v52 = vadd.f32 %v630_v9, %v362_v48  ;;  %v394_v59 = vmax.f32 %v392_v30, %v393_v44 }
 0x10e   : > { %v380_v53 = vmax.f32 %v378_v37, %v379_v45  ;;  %v385_v54 = vmax.f32 %v383_v39, %v384_v47  ;;  %v419_v55 = vrot.slane %v418_v49, 2  ;;  %v424_v57 = vrot.slane %v423_v51, 4 }
 0x10f   : > { %v404_v56 = vmax.f32 %v402_v42, %v403_v50  ;;  %v409_v58 = vsel %vm296_vm0, %v363_v52, -inf  ;;  %v400_v60 = vrot.slane %v399_v46, 1  ;;  %v432_v7 = vpack.c.bf16 %v394_v59, %v394_v59  ;;  %v641_v42 = vld [vmem:[%s1055_s4] ss:$0 sm:$0xff] }
 0x110   : > { %v386_v61 = vrot.slane %v385_v54, 1  ;;  %v420_v62 = vmax.f32 %v418_v49, %v419_v55  ;;  %v425_v0 = vmax.f32 %v423_v51, %v424_v57  ;;  %v410_v1 = vrot.slane %v409_v58, 4 }
 0x111   : > { %v405_v63 = vrot.slane %v404_v56, 2  ;;  %v430_v2 = vpack.c.bf16 %v380_v53, %v380_v53  ;;  %v401_v8 = vmax.f32 %v399_v46, %v400_v60  ;;  %v459_v21 = vunpack.c.l.b16 %v432_v7 }
 0x112   : > { %v387_v3 = vmax.f32 %v385_v54, %v386_v61  ;;  %v426_v5 = vrot.slane %v425_v0, 2  ;;  %v411_v6 = vmax.f32 %v409_v58, %v410_v1  ;;  %v421_v10 = vrot.slane %v420_v62, 1 }
 0x113   : > { %v406_v4 = vmax.f32 %v404_v56, %v405_v63  ;;  %v457_v14 = vunpack.c.l.b16 %v430_v2  ;;  %v433_v19 = vpack.c.bf16 %v401_v8, %v401_v8 }
 0x114   : > { %v431_v9 = vpack.c.bf16 %v387_v3, %v387_v3  ;;  %v427_v12 = vmax.f32 %v425_v0, %v426_v5  ;;  %v412_v13 = vrot.slane %v411_v6, 2  ;;  %v422_v22 = vmax.f32 %v420_v62, %v421_v10 }
 0x115   : > { %v407_v11 = vrot.slane %v406_v4, 1  ;;  %v460_v27 = vunpack.c.l.b16 %v433_v19 }
 0x116   : > { %v458_v15 = vunpack.c.l.b16 %v431_v9  ;;  %v428_v17 = vrot.slane %v427_v12, 1  ;;  %v413_v18 = vmax.f32 %v411_v6, %v412_v13  ;;  %v436_v29 = vpack.c.bf16 %v422_v22, %v422_v22 }
 0x117   : > { %v408_v16 = vmax.f32 %v406_v4, %v407_v11 }
 0x118   : > { %v466_v20 = vsel %vm465_vm2, %v458_v15, %v457_v14  ;;  %v429_v24 = vmax.f32 %v427_v12, %v428_v17  ;;  %v414_v25 = vrot.slane %v413_v18, 1  ;;  %v463_v35 = vunpack.c.l.b16 %v436_v29 }
 0x119   : > { %v434_v23 = vpack.c.bf16 %v408_v16, %v408_v16  ;;  %v468_v26 = vsel %vm467_vm3, %v459_v21, %v466_v20 }
 0x11a   : > { %v415_v28 = vmax.f32 %v413_v18, %v414_v25  ;;  %v470_v31 = vsel %vm469_vm4, %v460_v27, %v468_v26  ;;  %v437_v32 = vpack.c.bf16 %v429_v24, %v429_v24 }
 0x11b   : > { %v461_v30 = vunpack.c.l.b16 %v434_v23 }
 0x11c   : > { %v435_v33 = vpack.c.bf16 %v415_v28, %v415_v28  ;;  %v464_v37 = vunpack.c.l.b16 %v437_v32 }
 0x11d   : > { %v472_v36 = vsel %vm471_vm5, %v461_v30, %v470_v31 }
 0x11e   : > { %v462_v34 = vunpack.c.l.b16 %v435_v33 }
 0x120   : > { %v474_v38 = vsel %vm473_vm6, %v462_v34, %v472_v36 }
 0x121   : > { %v476_v39 = vsel %vm475_vm7, %v463_v35, %v474_v38 }
 0x122   : > { %v478_v40 = vsel %vm477_vm8, %v464_v37, %v476_v39 }
 0x123   : > { %v479_v41 = vpack.c.b16 %v478_v40, %v478_v40 }
 0x125   : > { %676 = vmatmul.mubr.msk.bf16.vlgmr.msra.gmra.mxu1 %vm296_vm0, %v479_v41 }
 0x1e5   : > { %v529_v43 = vpop.f32.mrf.mxu1 }
 0x1e6   : > { %v530_v44 = vadd.f32 %v641_v42, %v529_v43 }
 0x1e7   : > { %v677_v45 = vpop.f32.mrf.mxu1 }
 0x1e8   : > { %536 = vst.msk [vmem:[%s242_s28] sm:$0xff] %vm535_vm9, %v530_v44 }
 0x1e9   : > { %v532_v46 = vpop.f32.mrf.mxu1 }
 0x1ea   : > { %778 = shalt.err (!%p775_p10)
}
 0x1eb   : > { %s779_s10 = scalar_lea.hbm %s1008_s16, 128  ;;  %s783_s13 = scalar_lea.hbm %s1056_s5, 256 }
 0x1ec   : > { %p780_p0 = scmp.ne.s32.totalorder %s1008_s16, %s779_s10  ;;  %p784_p1 = scmp.lt.s32.totalorder %s1008_s16, %s1056_s5 }
 0x1ed   : > { %p785_p3 = scmp.lt.s32.totalorder %s783_s13, %s779_s10 }
 0x1ee   : > { %p781_p2 = pnand %p780_p0, %p1065_p12 }
 0x1ef   : > { %p786_p6 = por %p785_p3, %p784_p1 }
 0x1f0   : > { %p782_p9 = pneg %p781_p2 }
 0x1f2   : > { %p787_p11 = pnand %p786_p6, %p782_p9 }
 0x1f4   : > { %790 = shalt.err (!%p787_p11)
}
 0x1f5   : > { %681 = dma.vmem_to_hbm [thread:$0]  (%p1065_p12), %s1010_s15, 128, %s1008_s16, %s538_s29   ;;  %v678_v47 = vpop.f32.mrf.mxu1 }
 0x1f6 PF: > { %s563_s26 = sand.u32 1, %s817_s18   ;;  %p1066_p13 = scmp.ne.s32.totalorder %s1062_s6, 0 }
 0x1f7   : > { %p1067_p4 = scmp.ge.s32.totalorder %s829_s21, 2  ;;  %s564_s28 = scalar_lea.sflag [#allocation4], %s563_s26 }
 0x1f9   : > { %p688_p5 = pnand %p1067_p4, %p1066_p13 }
 0x1fb   : > { %p689_p7 = pneg %p688_p5 }
 0x1fd   : > { %812 = dma.done.wait (%p689_p7), %s564_s28, 128  }
 0x1fe   : > { %814 = vsyncadd (%p689_p7), %s564_s28, 4294967168  ;;  %p18_p8 = scmp.ge.s32.totalorder %s892_s24, 4   ;;  %s1068_s18 = smov %s821_s19 }
 0x1ff   : > { %s1069_s19 = smov %s825_s20  ;;  %s1070_s20 = smov %s904_s27 }
 0x200   : > { %s1071_s21 = smov %s892_s24  ;;  %20 = sbr.rel (!%p18_p8) target bundleno = 5 (0x5), region = 85 }
 0x205   :  { %569 = vsyncpa [#allocation3], 1 }
 0x206   :  { %571 = vsyncpa [#allocation3 + $0x1], 1 }
 0x207   :  { %572 = vsyncpa [#allocation4], 1 }
 0x208   :  { %574 = vsyncpa [#allocation4 + $0x1], 1 }

</bundles_post_ra>
